<compile_context>
chip_gen: v5e
topology: v5e:2x2
jax: 0.10.0
libtpu: 0.0.40
codegen_flags: <defaults>
</compile_context>

<pallas_src>
import jax
import jax.numpy as jnp
from jax.experimental import pallas as pl
from jax.experimental.pallas import tpu as pltpu

N_STATES = 4          # CartPole observation dim
N_ACTIONS = 2         # CartPole action dim
HIDDEN = 128

PAD_STATES = 16                      # x features / W1 rows, bf16 (16,128) tile aligned
OUT_PAD = 8                          # stored logit lanes (>= N_ACTIONS, sublane multiple)
W1_OFF = 0
W2_OFF = PAD_STATES                  # 16
W3_OFF = PAD_STATES + HIDDEN         # 144
W_SLAB_ROWS = PAD_STATES + 2 * HIDDEN  # 272
NEG_LOGIT = -1e30                    # kills padded softmax columns


def actor_kernel(x_ref, w_ref, b_ref, o_ref):
    # Packed parameter slab (bf16, tile-aligned offsets), biases (f32).
    w1 = w_ref[W1_OFF:W1_OFF + PAD_STATES, :]      # (16, 128)
    w2 = w_ref[W2_OFF:W2_OFF + HIDDEN, :]          # (128, 128)
    w3 = w_ref[W3_OFF:W3_OFF + HIDDEN, :]          # (128, 128), cols >= 2 are zero
    b1 = b_ref[0:1, :]                             # (1, 128)
    b2 = b_ref[1:2, :]
    b3 = b_ref[2:3, :]                             # cols >= N_ACTIONS == -1e30

    # ---- layer 1: Linear(n_states, 128) + ReLU (bf16 MXU, f32 accumulate) ----
    h1 = jnp.dot(x_ref[...], w1, preferred_element_type=jnp.float32)
    h1 = jnp.maximum(h1 + b1, 0.0).astype(jnp.bfloat16)

    # ---- layer 2: Linear(128, 128) + ReLU ----
    h2 = jnp.dot(h1, w2, preferred_element_type=jnp.float32)
    h2 = jnp.maximum(h2 + b2, 0.0).astype(jnp.bfloat16)

    # ---- layer 3: Linear(128, n_actions) padded lane-dense to 128 logits ----
    logits = jnp.dot(h2, w3, preferred_element_type=jnp.float32) + b3

    # ---- softmax over 128 lanes (padded cols underflow to exactly 0) ----
    m = jnp.max(logits, axis=-1, keepdims=True)
    e = jnp.exp(logits - m)
    denom = jnp.sum(e, axis=-1, keepdims=True)
    probs = e / denom                              # exact: probs feed log-prob terms
    # Store only the first OUT_PAD lanes -> 16x smaller HBM writeback.
    o_ref[...] = probs[:, :OUT_PAD]


def _round_up(x, m):
    return ((x + m - 1) // m) * m


def _pick_tiling(batch):
    """Adaptive batch tiling.

    Small batches: one minimally padded tile. Large batches: tiles up to 1024
    rows (amortize the ~0.35us per-grid-step overhead) and always >= 2 tiles
    so dimension_semantics=("parallel",) shards across both v7x TensorCores.
    """
    b8 = _round_up(max(batch, 1), 8)
    if b8 <= 256:
        return b8, 1
    tile = min(1024, _round_up(pl.cdiv(b8, 2), 8))
    return tile, pl.cdiv(b8, tile)


def actor_forward(x, packed_params):
    """x: (B, n_states) f32 -> (B, n_actions) softmax probabilities."""
    w_slab, b_slab = packed_params
    B = x.shape[0]
    batch_tile, num_tiles = _pick_tiling(B)
    B_pad = num_tiles * batch_tile

    # Pad batch and feature dims (zeros are harmless: padded rows are sliced off).
    x_pad = jnp.zeros((B_pad, PAD_STATES), jnp.bfloat16)
    x_pad = x_pad.at[:B, :N_STATES].set(x.astype(jnp.bfloat16))

    cost = pl.CostEstimate(
        flops=2 * B_pad * (PAD_STATES * HIDDEN + 2 * HIDDEN * HIDDEN),
        transcendentals=B_pad * HIDDEN,
        bytes_accessed=(B_pad * PAD_STATES * 2          # x (bf16)
                        + W_SLAB_ROWS * HIDDEN * 2      # weight slab (bf16)
                        + 8 * HIDDEN * 4                # bias slab (f32)
                        + B_pad * OUT_PAD * 4),         # output (f32)
    )

    out = pl.pallas_call(
        actor_kernel,
        out_shape=jax.ShapeDtypeStruct((B_pad, OUT_PAD), jnp.float32),
        grid_spec=pltpu.PrefetchScalarGridSpec(
            num_scalar_prefetch=0,
            grid=(num_tiles,),
            in_specs=[
                pl.BlockSpec((batch_tile, PAD_STATES), lambda i: (i, 0)),
                # constant block index -> parameters stay VMEM-resident across tiles
                pl.BlockSpec((W_SLAB_ROWS, HIDDEN), lambda i: (0, 0)),
                pl.BlockSpec((8, HIDDEN), lambda i: (0, 0)),
            ],
            out_specs=pl.BlockSpec((batch_tile, OUT_PAD), lambda i: (i, 0)),
        ),
        compiler_params=pltpu.CompilerParams(
            dimension_semantics=("parallel",)),
        cost_estimate=cost,
    )(x_pad, w_slab, b_slab)

    # Trailing slice now only touches (B_pad, 8) f32; callers that can consume
    # the padded output directly should do so and skip this.
    return out[:B, :N_ACTIONS]


def init_params(key):
    """nn.Linear-style init (uniform +-1/sqrt(fan_in)); weights stored as W^T."""
    ks = jax.random.split(key, 6)

    def lin(kw, kb, fan_in, fan_out):
        bound = 1.0 / jnp.sqrt(fan_in)
        w = jax.random.uniform(kw, (fan_in, fan_out), jnp.float32, -bound, bound)
        b = jax.random.uniform(kb, (fan_out,), jnp.float32, -bound, bound)
        return w, b

    w1, b1 = lin(ks[0], ks[1], N_STATES, HIDDEN)
    w2, b2 = lin(ks[2], ks[3], HIDDEN, HIDDEN)
    w3, b3 = lin(ks[4], ks[5], HIDDEN, N_ACTIONS)
    return (w1, b1, w2, b2, w3, b3)


def pack_params(params):
    """Pack weights into one tile-aligned bf16 slab and biases into one f32 slab."""
    w1, b1, w2, b2, w3, b3 = params

    w_slab = jnp.zeros((W_SLAB_ROWS, HIDDEN), jnp.float32)
    w_slab = w_slab.at[W1_OFF:W1_OFF + N_STATES, :].set(w1)
    w_slab = w_slab.at[W2_OFF:W2_OFF + HIDDEN, :].set(w2)
    w_slab = w_slab.at[W3_OFF:W3_OFF + HIDDEN, :N_ACTIONS].set(w3)
    w_slab = w_slab.astype(jnp.bfloat16)

    b_slab = jnp.zeros((8, HIDDEN), jnp.float32)
    b_slab = b_slab.at[0, :].set(b1)
    b_slab = b_slab.at[1, :].set(b2)
    b_slab = b_slab.at[2, :].set(jnp.full((HIDDEN,), NEG_LOGIT, jnp.float32))
    b_slab = b_slab.at[2, :N_ACTIONS].set(b3)
    return w_slab, b_slab


def actor_reference(x, params):
    """Pure-JAX f32 reference of the PyTorch forward."""
    w1, b1, w2, b2, w3, b3 = params
    h1 = jnp.maximum(x @ w1 + b1, 0.0)
    h2 = jnp.maximum(h1 @ w2 + b2, 0.0)
    logits = h2 @ w3 + b3
    return jax.nn.softmax(logits, axis=-1)


if __name__ == "__main__":
    key = jax.random.PRNGKey(0)
    pkey, xkey1, xkey2 = jax.random.split(key, 3)

    params = init_params(pkey)
    packed = pack_params(params)

    # Small user-facing batch; adaptive tiling gives one minimally padded tile.
    x_small = jax.random.normal(xkey1, (8, N_STATES), jnp.float32)
    probs = jax.block_until_ready(actor_forward(x_small, packed))
    ref = actor_reference(x_small, params)
    assert probs.shape == (8, N_ACTIONS)
    assert bool(jnp.all(probs >= 0.0))
    assert jnp.allclose(jnp.sum(probs, axis=-1), 1.0, atol=1e-3)
    assert jnp.allclose(probs, ref, atol=2e-2)

    # Larger stacked batch exercising the multi-tile "parallel" batch grid (2 tiles).
    x_big = jax.random.normal(xkey2, (300, N_STATES), jnp.float32)
    probs_big = jax.block_until_ready(actor_forward(x_big, packed))
    ref_big = actor_reference(x_big, params)
    assert probs_big.shape == (300, N_ACTIONS)
    assert jnp.allclose(jnp.sum(probs_big, axis=-1), 1.0, atol=1e-3)
    assert jnp.allclose(probs_big, ref_big, atol=2e-2)

    print("KERNEL_OK")
</pallas_src>

<mosaic_0001>
module attributes {stable_mosaic.version = 11 : i64} {
  func.func @actor_kernel(%arg0: i32, %arg1: memref<8x16xbf16, #tpu.memory_space<vmem>>, %arg2: memref<272x128xbf16, #tpu.memory_space<vmem>>, %arg3: memref<8x128xf32, #tpu.memory_space<vmem>>, %arg4: memref<8x8xf32, #tpu.memory_space<vmem>>) attributes {dimension_semantics = [#tpu.dimension_semantics<parallel>], iteration_bounds = array<i64: 1>, scalar_prefetch = 0 : i64, scratch_operands = 0 : i64, tpu.core_type = #tpu.core_type<tc>, window_params = [{transform_indices = @transform_0, window_bounds = array<i64: 8, 16>}, {pipeline_mode = #tpu.pipeline_mode<synchronous>, transform_indices = @transform_1, window_bounds = array<i64: 272, 128>}, {pipeline_mode = #tpu.pipeline_mode<synchronous>, transform_indices = @transform_2, window_bounds = array<i64: 8, 128>}, {transform_indices = @transform_3, window_bounds = array<i64: 8, 8>}]} {
    %c0 = arith.constant 0 : index
    %c0_0 = arith.constant 0 : index
    %0 = vector.load %arg2[%c0, %c0_0] : memref<272x128xbf16, #tpu.memory_space<vmem>>, vector<16x128xbf16>
    %c16 = arith.constant 16 : index
    %c0_1 = arith.constant 0 : index
    %1 = vector.load %arg2[%c16, %c0_1] : memref<272x128xbf16, #tpu.memory_space<vmem>>, vector<128x128xbf16>
    %c144 = arith.constant 144 : index
    %c0_2 = arith.constant 0 : index
    %2 = vector.load %arg2[%c144, %c0_2] : memref<272x128xbf16, #tpu.memory_space<vmem>>, vector<128x128xbf16>
    %c0_3 = arith.constant 0 : index
    %c0_4 = arith.constant 0 : index
    %3 = vector.load %arg3[%c0_3, %c0_4] : memref<8x128xf32, #tpu.memory_space<vmem>>, vector<1x128xf32>
    %c1 = arith.constant 1 : index
    %c0_5 = arith.constant 0 : index
    %4 = vector.load %arg3[%c1, %c0_5] : memref<8x128xf32, #tpu.memory_space<vmem>>, vector<1x128xf32>
    %c2 = arith.constant 2 : index
    %c0_6 = arith.constant 0 : index
    %5 = vector.load %arg3[%c2, %c0_6] : memref<8x128xf32, #tpu.memory_space<vmem>>, vector<1x128xf32>
    %c0_7 = arith.constant 0 : index
    %c0_8 = arith.constant 0 : index
    %6 = vector.load %arg1[%c0_7, %c0_8] : memref<8x16xbf16, #tpu.memory_space<vmem>>, vector<8x16xbf16>
    %cst = arith.constant dense<0.000000e+00> : vector<8x128xf32>
    %7 = tpu.matmul %6, %0, %cst {dimension_numbers = #tpu.dot_dimension_numbers<[1], [0], [0], [1], [0, 0, 1, 1], [], []>} : vector<8x16xbf16>, vector<16x128xbf16>, vector<8x128xf32> -> vector<8x128xf32>
    %8 = vector.broadcast %3 : vector<1x128xf32> to vector<8x128xf32>
    %9 = arith.addf %7, %8 : vector<8x128xf32>
    %cst_9 = arith.constant 0.000000e+00 : f32
    %10 = vector.broadcast %cst_9 : f32 to vector<8x128xf32>
    %11 = arith.maximumf %9, %10 : vector<8x128xf32>
    %12 = arith.truncf %11 : vector<8x128xf32> to vector<8x128xbf16>
    %cst_10 = arith.constant dense<0.000000e+00> : vector<8x128xf32>
    %13 = tpu.matmul %12, %1, %cst_10 {dimension_numbers = #tpu.dot_dimension_numbers<[1], [0], [0], [1], [0, 0, 1, 1], [], []>} : vector<8x128xbf16>, vector<128x128xbf16>, vector<8x128xf32> -> vector<8x128xf32>
    %14 = vector.broadcast %4 : vector<1x128xf32> to vector<8x128xf32>
    %15 = arith.addf %13, %14 : vector<8x128xf32>
    %cst_11 = arith.constant 0.000000e+00 : f32
    %16 = vector.broadcast %cst_11 : f32 to vector<8x128xf32>
    %17 = arith.maximumf %15, %16 : vector<8x128xf32>
    %18 = arith.truncf %17 : vector<8x128xf32> to vector<8x128xbf16>
    %cst_12 = arith.constant dense<0.000000e+00> : vector<8x128xf32>
    %19 = tpu.matmul %18, %2, %cst_12 {dimension_numbers = #tpu.dot_dimension_numbers<[1], [0], [0], [1], [0, 0, 1, 1], [], []>} : vector<8x128xbf16>, vector<128x128xbf16>, vector<8x128xf32> -> vector<8x128xf32>
    %20 = vector.broadcast %5 : vector<1x128xf32> to vector<8x128xf32>
    %21 = arith.addf %19, %20 : vector<8x128xf32>
    %cst_13 = arith.constant dense<0xFF800000> : vector<8xf32>
    %22 = vector.multi_reduction <maximumf>, %21, %cst_13 [1] : vector<8x128xf32> to vector<8xf32>
    %23 = vector.shape_cast %22 : vector<8xf32> to vector<8x1xf32>
    %24 = vector.broadcast %23 : vector<8x1xf32> to vector<8x128xf32>
    %25 = arith.subf %21, %24 : vector<8x128xf32>
    %26 = math.exp %25 : vector<8x128xf32>
    %cst_14 = arith.constant dense<0.000000e+00> : vector<8xf32>
    %27 = vector.multi_reduction <add>, %26, %cst_14 [1] : vector<8x128xf32> to vector<8xf32>
    %28 = vector.shape_cast %27 : vector<8xf32> to vector<8x1xf32>
    %29 = vector.broadcast %28 : vector<8x1xf32> to vector<8x128xf32>
    %30 = arith.divf %26, %29 : vector<8x128xf32>
    %31 = vector.extract_strided_slice %30 {offsets = [0, 0], sizes = [8, 8], strides = [1, 1]} : vector<8x128xf32> to vector<8x8xf32>
    %c0_15 = arith.constant 0 : index
    %c0_16 = arith.constant 0 : index
    %32 = vector.load %arg4[%c0_15, %c0_16] : memref<8x8xf32, #tpu.memory_space<vmem>>, vector<8x8xf32>
    tpu.vector_store %arg4[%c0_15, %c0_16], %31 {strides = array<i32>} : memref<8x8xf32, #tpu.memory_space<vmem>>, vector<8x8xf32>,
    return
  }
  func.func @transform_0(%arg0: i32) -> (i32, i32) {
    %c0_i32 = arith.constant 0 : i32
    %c0_i32_0 = arith.constant 0 : i32
    return %arg0, %c0_i32 : i32, i32
  }
  func.func @transform_1(%arg0: i32) -> (i32, i32) {
    %c0_i32 = arith.constant 0 : i32
    %c0_i32_0 = arith.constant 0 : i32
    %c0_i32_1 = arith.constant 0 : i32
    return %c0_i32, %c0_i32_0 : i32, i32
  }
  func.func @transform_2(%arg0: i32) -> (i32, i32) {
    %c0_i32 = arith.constant 0 : i32
    %c0_i32_0 = arith.constant 0 : i32
    %c0_i32_1 = arith.constant 0 : i32
    return %c0_i32, %c0_i32_0 : i32, i32
  }
  func.func @transform_3(%arg0: i32) -> (i32, i32) {
    %c0_i32 = arith.constant 0 : i32
    %c0_i32_0 = arith.constant 0 : i32
    return %arg0, %c0_i32 : i32, i32
  }
}

</mosaic_0001>

<bundles_post_ra>
// kernel: tpu_custom_call.1
= control target key start
LH: loop header
LB: loop body
LE: loop exit
PB: predicated region body
PF: predicated region fallthrough
CT: control target
= control target key end

     0   :  { %8 = vsyncpa [#allocation3], 0  ;;  %s530_s0 = inlined_call_operand.hbm [shape: bf16[8,16], index: 0, kind: input, shape index: {}]   ;;  %s531_s1 = inlined_call_operand.hbm [shape: bf16[272,128], index: 1, kind: input, shape index: {}]   ;;  %s532_s2 = inlined_call_operand.hbm [shape: f32[8,128], index: 2, kind: input, shape index: {}]   ;;  %s533_s3 = inlined_call_operand.hbm [shape: f32[8,8], index: 3, kind: output, shape index: {}]  }
   0x1   :  { %9 = vsyncpa [#allocation6], 0  ;;  %s26_s14 = sshll.u32 %s531_s1, 4  ;;  %s27_s14 = int_to_ptr.hbm [resolvable:$true] %s26_s14 }
   0x2   :  { %10 = vsyncpa [#allocation4], 0  ;;  %s492_s15 = smov [#allocation5]   ;;  %s16_s19 = sshll.u32 %s530_s0, 4  ;;  %s17_s19 = int_to_ptr.hbm [resolvable:$true] %s16_s19 }
   0x3   :  { %s28_s16 = sshll.u32 %s492_s15, 4  ;;  %s493_s20 = smov 64   ;;  %s29_s16 = int_to_ptr.vmem [resolvable:$true] %s28_s16 }
   0x4   :  { %s494_s21 = smov 4   ;;  %s495_s22 = smov [#allocation2]  }
   0x5   :  { %34 = dma.hbm_to_vmem [thread:$0]  %s27_s14, 2176, %s29_s16, [#allocation6], %s493_s20, %s493_s20, %s494_s21  }
   0x6   :  { %s18_s23 = sshll.u32 %s495_s22, 4  ;;  %s40_s26 = sshll.u32 %s532_s2, 4  ;;  %s19_s23 = int_to_ptr.vmem [resolvable:$true] %s18_s23  ;;  %s41_s26 = int_to_ptr.hbm [resolvable:$true] %s40_s26 }
   0x7   :  { %21 = dma.hbm_to_vmem [thread:$0]  %s17_s19, 64, %s19_s23, [#allocation3]  }
   0x8   :  { %s496_s1 = smov [#allocation7]  }
   0x9   :  { %s42_s27 = sshll.u32 %s496_s1, 4  ;;  %s43_s27 = int_to_ptr.vmem [resolvable:$true] %s42_s27 }
   0xa   :  { %45 = dma.hbm_to_vmem [thread:$0]  %s41_s26, 128, %s43_s27, [#allocation6]  }
   0xb   :  { %486 = dma.done.wait [#allocation3], 64  }
   0xc   :  { %487 = vsyncadd [#allocation3], 4294967232 }
   0xd   :  { %488 = dma.done.wait [#allocation6], 2304  }
   0xe   :  { %489 = vsyncadd [#allocation6], 4294964992  ;;  %v360_v0 = vld [vmem:[#allocation5] sm:$0xff]  ;;  %v96_v2 = vld [vmem:[#allocation2] sm:$0xf]  ;;  %vm104_vm0 = vcmask 130048  }
   0xf   :  { %v368_v1 = vld [vmem:[#allocation5 + $0x40] sm:$0xff]  ;;  %115 = vmatpush.bf16.msra.mxu0 %v360_v0  ;;  %v367_v3 = vld [vmem:[#allocation5 + $0x38] sm:$0xff]  ;;  %v366_v4 = vld [vmem:[#allocation5 + $0x30] sm:$0xff]  ;;  %s497_s0 = smov [#allocation8]   ;;  %s280_s30 = sshll.u32 %s533_s3, 4  ;;  %vm271_vm5 = vcmask 64512   ;;  %s281_s30 = int_to_ptr.hbm [resolvable:$true] %s280_s30 }
  0x10   :  { %172 = vmatpush.bf16.msra.mxu1 %v368_v1  ;;  %v365_v5 = vld [vmem:[#allocation5 + $0x28] sm:$0xff]  ;;  %v364_v6 = vld [vmem:[#allocation5 + $0x20] sm:$0xff]  ;;  %v363_v7 = vld [vmem:[#allocation5 + $0x18] sm:$0xff]  ;;  %s278_s2 = sshll.u32 %s497_s0, 4  ;;  %s279_s2 = int_to_ptr.vmem [resolvable:$true] %s278_s2 }
  0x11   :  { %v362_v8 = vld [vmem:[#allocation5 + $0x10] sm:$0xff]  ;;  %v361_v9 = vld [vmem:[#allocation5 + $0x8] sm:$0xff]  ;;  %v376_v10 = vld [vmem:[#allocation5 + $0x80] sm:$0xff] }
  0x12   :  { %295 = vmatmul.msk.bf16.vlgmr.msra.gmra.mxu0 %vm104_vm0, %v96_v2  ;;  %236 = vmatpush.bf16.msra.mxu2 %v376_v10  ;;  %v375_v11 = vld [vmem:[#allocation5 + $0x78] sm:$0xff]  ;;  %v374_v12 = vld [vmem:[#allocation5 + $0x70] sm:$0xff]  ;;  %v373_v13 = vld [vmem:[#allocation5 + $0x68] sm:$0xff] }
  0x13   :  { %v372_v14 = vld [vmem:[#allocation5 + $0x60] sm:$0xff]  ;;  %v371_v15 = vld [vmem:[#allocation5 + $0x58] sm:$0xff]  ;;  %v383_v16 = vld [vmem:[#allocation7] ss:$0 sm:$0xff] }
  0x14   :  { %173 = vmatpush.bf16.msra.mxu1 %v367_v3  ;;  %v370_v22 = vld [vmem:[#allocation5 + $0x50] sm:$0xff]  ;;  %v369_v23 = vld [vmem:[#allocation5 + $0x48] sm:$0xff] }
  0x15   :  { %v384_v24 = vld [vmem:[#allocation7 + $0x1] ss:$0 sm:$0xff]  ;;  %v385_v30 = vld [vmem:[#allocation7 + $0x2] ss:$0 sm:$0xff] }
  0x16   :  { %237 = vmatpush.bf16.msra.mxu2 %v375_v11 }
  0x18   :  { %174 = vmatpush.bf16.msra.mxu1 %v366_v4 }
  0x1a   :  { %238 = vmatpush.bf16.msra.mxu2 %v374_v12 }
  0x1c   :  { %175 = vmatpush.bf16.msra.mxu1 %v365_v5 }
  0x1e   :  { %239 = vmatpush.bf16.msra.mxu2 %v373_v13 }
  0x20   :  { %176 = vmatpush.bf16.msra.mxu1 %v364_v6 }
  0x22   :  { %240 = vmatpush.bf16.msra.mxu2 %v372_v14 }
  0x24   :  { %177 = vmatpush.bf16.msra.mxu1 %v363_v7 }
  0x26   :  { %241 = vmatpush.bf16.msra.mxu2 %v371_v15 }
  0x28   :  { %178 = vmatpush.bf16.msra.mxu1 %v362_v8 }
  0x2a   :  { %242 = vmatpush.bf16.msra.mxu2 %v370_v22 }
  0x2c   :  { %179 = vmatpush.bf16.msra.mxu1 %v361_v9 }
  0x2e   :  { %243 = vmatpush.bf16.msra.mxu2 %v369_v23 }
  0x8f   :  { %v117_v17 = vpop.f32.mrf.mxu0 }
  0x90   :  { %v118_v18 = vadd.f32 %v383_v16, %v117_v17 }
  0x92   :  { %v121_v19 = vmax.f32 %v118_v18, 0.0 }
  0x94   :  { %v122_v20 = vpack.c.bf16 %v121_v19, %v121_v19 }
  0x96   :  { %180 = vmatmul.bf16.vlgmr.msra.gmra.mxu1 %v122_v20 }
  0x97   :  { %v119_v21 = vpop.f32.mrf.mxu0 }
 0x113   :  { %v181_v25 = vpop.f32.mrf.mxu1 }
 0x114   :  { %v182_v26 = vadd.f32 %v384_v24, %v181_v25 }
 0x116   :  { %v185_v27 = vmax.f32 %v182_v26, 0.0 }
 0x118   :  { %v186_v28 = vpack.c.bf16 %v185_v27, %v185_v27 }
 0x11a   :  { %244 = vmatmul.bf16.vlgmr.msra.gmra.mxu2 %v186_v28 }
 0x11b   :  { %v183_v29 = vpop.f32.mrf.mxu1 }
 0x19d   :  { %v245_v31 = vpop.f32.mrf.mxu2 }
 0x19e   :  { %v246_v32 = vadd.f32 %v385_v30, %v245_v31 }
 0x1a0   :  { %249 = vmax.xlane.f32.xlu0 %v246_v32 }
 0x1a5   :  { %v247_v33 = vpop.f32.mrf.mxu2 }
 0x213   :  { %v250_v34 = vpop.xlane.xlu0 %249 }
 0x214   :  { %v251_v35 = vsub.f32 %v246_v32, %v250_v34 }
 0x216   :  { %v252_v36 = vmul.f32 1.442695, %v251_v35 }
 0x218   :  { %386 = vpow2.f32 %v252_v36 }
 0x21e   :  { %v387_v37 = vpop.eup %386 }
 0x21f   :  { %254 = vadd.xlane.f32.xlu0 %v387_v37 }
 0x292   :  { %v255_v38 = vpop.xlane.xlu0 %254 }
 0x293   :  { %388 = vrcp.f32 %v255_v38  ;;  %v267_v42 = vand.u32 2147483648, %v255_v38  ;;  %v265_v44 = vand.u32 2147483647, %v255_v38  ;;  %vm261_vm2 = vweird.f32 %v255_v38 }
 0x295   :  { %v268_v46 = vor.u32 1.1754944e-38, %v267_v42  ;;  %vm266_vm4 = vcmp.eq.f32.partialorder %v265_v44, 8.507059e+37 }
 0x299   :  { %v389_v39 = vpop.eup %388 }
 0x29a   :  { %v257_v40 = vmul.f32 %v389_v39, %v255_v38  ;;  %vm262_vm1 = vweird.f32 %v389_v39 }
 0x29b   :  { %vm263_vm3 = vmor %vm261_vm2, %vm262_vm1 }
 0x29c   :  { %v258_v41 = vsub.f32 1.0, %v257_v40 }
 0x29e   :  { %v259_v43 = vmul.f32 %v389_v39, %v258_v41 }
 0x2a0   :  { %v260_v45 = vadd.f32 %v389_v39, %v259_v43 }
 0x2a2   :  { %v264_v47 = vsel %vm263_vm3, %v389_v39, %v260_v45 }
 0x2a3   :  { %v269_v48 = vsel %vm266_vm4, %v268_v46, %v264_v47 }
 0x2a4   :  { %v270_v49 = vmul.f32 %v387_v37, %v269_v48 }
 0x2a6   :  { %272 = vst.msk [vmem:[#allocation8] sm:$0xff] %vm271_vm5, %v270_v49 }
 0x2a7   :  { %283 = dma.vmem_to_hbm [thread:$0]  %s279_s2, 128, %s281_s30, [#allocation4]  }
 0x2a8   :  { %490 = dma.done.wait [#allocation4], 128  }
 0x2a9   :  { %491 = vsyncadd [#allocation4], 4294967168 }
 0x2aa   :  { %288 = vsyncpa [#allocation3], 1 }
 0x2ab   :  { %289 = vsyncpa [#allocation6], 1 }
 0x2ac   :  { %290 = vsyncpa [#allocation4], 1 }

</bundles_post_ra>
